<compile_context>
chip_gen: v5e
topology: v5e:2x2
jax: 0.10.0
libtpu: 0.0.40
codegen_flags: <defaults>
</compile_context>

<pallas_src>
import functools

import jax
import jax.numpy as jnp
from jax.experimental import pallas as pl
from jax.experimental.pallas import tpu as pltpu


_LANE = 128      # TPU lane width
_SUBLANE = 8     # TPU sublane width


def _round_up(x, m):
    return (x + m - 1) // m * m


def _device_defaults():
    """(max Cout tile, vmem_limit_bytes) per TPU generation."""
    kind = ""
    try:
        kind = jax.devices()[0].device_kind.lower()
    except Exception:
        pass
    if "v7" in kind:
        return 256, 48 * 1024 * 1024        # 256-wide MXU, 64 MiB physical VMEM
    if "v6" in kind:
        return 256, 96 * 1024 * 1024        # 256-wide MXU, 128 MiB physical VMEM
    if "v5" in kind or "v4" in kind:
        return 128, 64 * 1024 * 1024        # 128-wide MXU, 128 MiB physical VMEM
    return 128, 32 * 1024 * 1024            # unknown: conservative defaults


def _conv_pack_kernel(x_ref, w_ref, b_ref, o_ref, *, n_taps, th):
    """One grid step = (one Cout tile) x (one image) x (one band of th output rows).

    x_ref : (1, 1, th + n_taps - 1, Wo_pad, Kpad)  lane-packed conv patches
    w_ref : (n_taps, Kpad, TC)                     packed weights (resident tile)
    b_ref : (1, TC) float32                        bias tile
    o_ref : (1, th, Wo_pad, TC)                    output tile
    """
    wo = x_ref.shape[3]
    kp = x_ref.shape[4]
    tc = o_ref.shape[3]
    m = th * wo

    def tap(t):
        # Slice on a major (non-tiled) dim + flatten over a sublane-aligned Wo_pad:
        # this is a view-level reshape, not a relayout copy.
        patch = x_ref[0, 0, t:t + th, :, :].reshape(m, kp)
        return jnp.dot(patch, w_ref[t], preferred_element_type=jnp.float32)

    acc = tap(0)
    for t in range(1, n_taps):          # static unroll; n_taps == 1 for the im2col path
        acc = acc + tap(t)
    acc = acc + b_ref[...]              # (1, TC) broadcasts over M; bias added once
    o_ref[0] = acc.reshape(th, wo, tc).astype(o_ref.dtype)


def conv_layer_pallas(x_nchw, weight, bias, *, stride,
                      compute_dtype=jnp.bfloat16,
                      out_dtype=jnp.float32,
                      target_block_m=1024):
    """ConvLayer.forward: ReflectionPad2d(k//2) then Conv2d(stride=stride, padding=0).

    x_nchw : (N, Cin, H, W) float32
    weight : (Cout, Cin, k, k)  (PyTorch layout)
    bias   : (Cout,)
    returns: (N, Cout, Ho, Wo) out_dtype, matching PyTorch semantics.
    """
    n, cin, h, w = x_nchw.shape
    cout, cin_w, k, k2 = weight.shape
    assert cin == cin_w and k == k2
    assert stride >= 1
    pad = k // 2
    assert pad < h and pad < w, "reflection padding requires pad < H and pad < W"

    hp, wp = h + 2 * pad, w + 2 * pad
    ho = (hp - k) // stride + 1
    wo = (wp - k) // stride + 1

    tc_max, vmem_limit = _device_defaults()
    coutp = _round_up(cout, _LANE)
    tc = tc_max if coutp % tc_max == 0 else _LANE
    n_c = coutp // tc

    # ---- choose the lane packing -------------------------------------------------
    # Full im2col (lane = (kh,kw,c)): single matmul per block, exact (non-overlapping)
    # row tiling, any stride.  Row-tap packing (lane = (kw,c)): k taps + (k-1)-row halo,
    # smaller HBM footprint when k*k*Cin would overflow the lane tile that k*Cin fits.
    k_full = _round_up(k * k * cin, _LANE)
    k_rows = _round_up(k * cin, _LANE)
    pack_kh = (k_full <= k_rows) or (stride != 1)
    # TODO(synk): for stride > 1 with large k*k*Cin, add an H-phase-split row-tap variant
    # so the full-im2col lane inflation can be avoided there as well.
    kpad = k_full if pack_kh else k_rows
    n_taps = 1 if pack_kh else k

    wo_pad = _round_up(wo, _SUBLANE)

    # ---- output-row tile: target M = th*Wo_pad ~ target_block_m, VMEM-checked -----
    in_isz = jnp.dtype(compute_dtype).itemsize
    out_isz = jnp.dtype(out_dtype).itemsize
    th = max(1, min(ho, target_block_m // wo_pad))

    def step_bytes(t):
        xb = (t + n_taps - 1) * wo_pad * kpad * in_isz
        ob = t * wo_pad * tc * out_isz
        wb = n_taps * kpad * tc * in_isz
        acc = t * wo_pad * tc * 4
        return 2 * (xb + ob) + 2 * wb + acc

    while th > 1 and step_bytes(th) > vmem_limit // 2:
        th = max(1, th // 2)

    n_h = -(-ho // th)                    # cdiv: last band is zero-padded, then sliced off
    ho_pad = n_h * th

    # ---- packed-patch build: NCHW -> NHWC, reflect pad, tap-shifted slices on the
    #      lane axis, zero pad to (8,128) tiles.  This is gather/pad glue that XLA
    #      fuses into ~one HBM pass producing the single packed array the kernel reads.
    x_nhwc = jnp.transpose(x_nchw, (0, 2, 3, 1))                        # (N, H, W, Cin)
    x_pad = jnp.pad(x_nhwc, ((0, 0), (pad, pad), (pad, pad), (0, 0)), mode="reflect")

    cols = []
    if pack_kh:
        for kh in range(k):
            for kw in range(k):
                cols.append(x_pad[:, kh:kh + (ho - 1) * stride + 1:stride,
                                     kw:kw + (wo - 1) * stride + 1:stride, :])
        patches = jnp.concatenate(cols, axis=-1)                        # (N, Ho, Wo, k*k*Cin)
        rows_total = ho_pad
    else:
        for kw in range(k):                                             # stride == 1 here
            cols.append(x_pad[:, :, kw:kw + wo, :])
        patches = jnp.concatenate(cols, axis=-1)                        # (N, Hp, Wo, k*Cin)
        rows_total = ho_pad + k - 1

    patches = jnp.pad(
        patches.astype(compute_dtype),
        ((0, 0), (0, rows_total - patches.shape[1]),
         (0, wo_pad - wo), (0, kpad - patches.shape[-1])))

    rows_in = th + n_taps - 1
    if pack_kh:
        # Exact, non-overlapping row bands: a free reshape, no halo duplication.
        x_blocks = patches.reshape(n, n_h, th, wo_pad, kpad)
    else:
        # Overlapping (halo'd) row bands; duplication fraction is (k-1)/th (small).
        x_blocks = jnp.stack(
            [patches[:, i * th: i * th + rows_in] for i in range(n_h)], axis=1)

    # ---- weights: (Cout, Cin, kh, kw) -> (n_taps, Kpad, Coutp); bias -> (1, Coutp) --
    w_khwc = jnp.transpose(weight, (2, 3, 1, 0))                        # (kh, kw, Cin, Cout)
    w_taps = w_khwc.reshape(n_taps, (k * k * cin) // n_taps, cout)
    w_taps = jnp.pad(w_taps, ((0, 0), (0, kpad - w_taps.shape[1]), (0, coutp - cout)))
    w_taps = w_taps.astype(compute_dtype)
    b_pad = jnp.pad(bias.astype(jnp.float32), (0, coutp - cout)).reshape(1, coutp)

    kernel = functools.partial(_conv_pack_kernel, n_taps=n_taps, th=th)

    flops = 2 * n * ho * wo * cout * cin * k * k
    bytes_accessed = (x_blocks.size * in_isz + w_taps.size * in_isz + b_pad.size * 4
                      + n * ho_pad * wo_pad * coutp * out_isz)

    out_nhwc = pl.pallas_call(
        kernel,
        out_shape=jax.ShapeDtypeStruct((n, ho_pad, wo_pad, coutp), out_dtype),
        grid_spec=pltpu.PrefetchScalarGridSpec(
            num_scalar_prefetch=0,
            # Cout tiles outermost: the weight/bias block index only changes with ci,
            # so those DMAs are elided across the whole (batch, row-band) sweep.
            grid=(n_c, n, n_h),
            in_specs=[
                pl.BlockSpec((1, 1, rows_in, wo_pad, kpad),
                             lambda ci, b, hi: (b, hi, 0, 0, 0)),
                pl.BlockSpec((n_taps, kpad, tc),
                             lambda ci, b, hi: (0, 0, ci)),
                pl.BlockSpec((1, tc),
                             lambda ci, b, hi: (0, ci)),
            ],
            out_specs=pl.BlockSpec((1, th, wo_pad, tc),
                                   lambda ci, b, hi: (b, hi, 0, ci)),
        ),
        compiler_params=pltpu.CompilerParams(
            dimension_semantics=("parallel", "parallel", "parallel"),
            vmem_limit_bytes=vmem_limit),
        cost_estimate=pl.CostEstimate(flops=flops, transcendentals=0,
                                      bytes_accessed=bytes_accessed),
    )(x_blocks, w_taps, b_pad)

    # glue: drop the row/col/Cout padding, NHWC -> NCHW to match the PyTorch convention.
    out_nhwc = out_nhwc[:, :ho, :wo, :cout]
    return jnp.transpose(out_nhwc, (0, 3, 1, 2))


def _reference(x_nchw, weight, bias, *, stride):
    """Pure-JAX reference (reflection pad + conv) for correctness checking."""
    pad = weight.shape[-1] // 2
    xp = jnp.pad(x_nchw, ((0, 0), (0, 0), (pad, pad), (pad, pad)), mode="reflect")
    out = jax.lax.conv_general_dilated(
        xp, weight, window_strides=(stride, stride), padding="VALID",
        dimension_numbers=("NCHW", "OIHW", "NCHW"))
    return out + bias[None, :, None, None]


if __name__ == "__main__":
    # Small config consistent with the module: ConvLayer(in=4, out=8, kernel=3, stride=1)
    N, CIN, H, W = 2, 4, 16, 16
    COUT, K, STRIDE = 8, 3, 1

    key = jax.random.PRNGKey(0)
    kx, kwt, kb = jax.random.split(key, 3)
    x = jax.random.normal(kx, (N, CIN, H, W), dtype=jnp.float32)
    # Deterministic "kaiming-uniform-like" init (synthetic, not a checkpoint load).
    fan_in = CIN * K * K
    bound = 1.0 / (fan_in ** 0.5)
    weight = jax.random.uniform(kwt, (COUT, CIN, K, K), jnp.float32, -bound, bound)
    bias = jax.random.uniform(kb, (COUT,), jnp.float32, -bound, bound)

    ref = _reference(x, weight, bias, stride=STRIDE)

    # f32 compute path: exact semantics of the PyTorch module.
    conv_f32 = jax.jit(functools.partial(conv_layer_pallas, stride=STRIDE,
                                         compute_dtype=jnp.float32))
    out_f32 = jax.block_until_ready(conv_f32(x, weight, bias))
    assert out_f32.shape == ref.shape, (out_f32.shape, ref.shape)
    assert jnp.allclose(out_f32, ref, atol=1e-4, rtol=1e-4), "f32 mismatch vs reference"

    # bf16 compute path (f32 accumulation): the MXU-friendly default.
    conv_bf16 = jax.jit(functools.partial(conv_layer_pallas, stride=STRIDE,
                                          compute_dtype=jnp.bfloat16))
    out_bf16 = jax.block_until_ready(conv_bf16(x, weight, bias))
    assert out_bf16.shape == ref.shape, (out_bf16.shape, ref.shape)
    assert jnp.allclose(out_bf16, ref, atol=2e-2, rtol=2e-2), "bf16 mismatch vs reference"

    print("KERNEL_OK")
</pallas_src>

<mosaic_0001>
module attributes {stable_mosaic.version = 11 : i64} {
  func.func @_conv_pack_kernel(%arg0: i32, %arg1: i32, %arg2: i32, %arg3: memref<1x1x16x16x128xf32, #tpu.memory_space<vmem>>, %arg4: memref<1x128x128xf32, #tpu.memory_space<vmem>>, %arg5: memref<1x128xf32, #tpu.memory_space<vmem>>, %arg6: memref<1x16x16x128xf32, #tpu.memory_space<vmem>>) attributes {dimension_semantics = [#tpu.dimension_semantics<parallel>, #tpu.dimension_semantics<parallel>, #tpu.dimension_semantics<parallel>], iteration_bounds = array<i64: 1, 2, 1>, scalar_prefetch = 0 : i64, scratch_operands = 0 : i64, tpu.core_type = #tpu.core_type<tc>, window_params = [{transform_indices = @transform_0, window_bounds = array<i64: 1, 1, 16, 16, 128>}, {transform_indices = @transform_1, window_bounds = array<i64: 1, 128, 128>}, {transform_indices = @transform_2, window_bounds = array<i64: 1, 128>}, {transform_indices = @transform_3, window_bounds = array<i64: 1, 16, 16, 128>}]} {
    %c0 = arith.constant 0 : index
    %c0_0 = arith.constant 0 : index
    %c0_1 = arith.constant 0 : index
    %c0_2 = arith.constant 0 : index
    %c0_3 = arith.constant 0 : index
    %0 = vector.load %arg3[%c0, %c0_0, %c0_1, %c0_2, %c0_3] : memref<1x1x16x16x128xf32, #tpu.memory_space<vmem>>, vector<1x1x16x16x128xf32>
    %1 = vector.shape_cast %0 : vector<1x1x16x16x128xf32> to vector<16x16x128xf32>
    %2 = vector.shape_cast %1 : vector<16x16x128xf32> to vector<256x128xf32>
    %c0_4 = arith.constant 0 : index
    %c0_5 = arith.constant 0 : index
    %c0_6 = arith.constant 0 : index
    %3 = vector.load %arg4[%c0_4, %c0_5, %c0_6] : memref<1x128x128xf32, #tpu.memory_space<vmem>>, vector<1x128x128xf32>
    %4 = vector.shape_cast %3 : vector<1x128x128xf32> to vector<128x128xf32>
    %cst = arith.constant dense<0.000000e+00> : vector<256x128xf32>
    %5 = tpu.matmul %2, %4, %cst {dimension_numbers = #tpu.dot_dimension_numbers<[1], [0], [0], [1], [0, 0, 1, 1], [], []>} : vector<256x128xf32>, vector<128x128xf32>, vector<256x128xf32> -> vector<256x128xf32>
    %c0_7 = arith.constant 0 : index
    %c0_8 = arith.constant 0 : index
    %6 = vector.load %arg5[%c0_7, %c0_8] : memref<1x128xf32, #tpu.memory_space<vmem>>, vector<1x128xf32>
    %7 = vector.broadcast %6 : vector<1x128xf32> to vector<256x128xf32>
    %8 = arith.addf %5, %7 : vector<256x128xf32>
    %9 = vector.shape_cast %8 : vector<256x128xf32> to vector<16x16x128xf32>
    %c0_9 = arith.constant 0 : index
    %c0_10 = arith.constant 0 : index
    %c0_11 = arith.constant 0 : index
    %c0_12 = arith.constant 0 : index
    %10 = vector.load %arg6[%c0_9, %c0_10, %c0_11, %c0_12] : memref<1x16x16x128xf32, #tpu.memory_space<vmem>>, vector<1x16x16x128xf32>
    %11 = vector.shape_cast %10 : vector<1x16x16x128xf32> to vector<16x16x128xf32>
    %12 = vector.shape_cast %9 : vector<16x16x128xf32> to vector<1x16x16x128xf32>
    tpu.vector_store %arg6[%c0_9, %c0_10, %c0_11, %c0_12], %12 {strides = array<i32>} : memref<1x16x16x128xf32, #tpu.memory_space<vmem>>, vector<1x16x16x128xf32>,
    return
  }
  func.func @transform_0(%arg0: i32, %arg1: i32, %arg2: i32) -> (i32, i32, i32, i32, i32) {
    %c0_i32 = arith.constant 0 : i32
    %c0_i32_0 = arith.constant 0 : i32
    %c0_i32_1 = arith.constant 0 : i32
    %c0_i32_2 = arith.constant 0 : i32
    return %arg1, %arg2, %c0_i32, %c0_i32_0, %c0_i32_1 : i32, i32, i32, i32, i32
  }
  func.func @transform_1(%arg0: i32, %arg1: i32, %arg2: i32) -> (i32, i32, i32) {
    %c0_i32 = arith.constant 0 : i32
    %c0_i32_0 = arith.constant 0 : i32
    %c0_i32_1 = arith.constant 0 : i32
    return %c0_i32, %c0_i32_0, %arg0 : i32, i32, i32
  }
  func.func @transform_2(%arg0: i32, %arg1: i32, %arg2: i32) -> (i32, i32) {
    %c0_i32 = arith.constant 0 : i32
    %c0_i32_0 = arith.constant 0 : i32
    return %c0_i32, %arg0 : i32, i32
  }
  func.func @transform_3(%arg0: i32, %arg1: i32, %arg2: i32) -> (i32, i32, i32, i32) {
    %c0_i32 = arith.constant 0 : i32
    %c0_i32_0 = arith.constant 0 : i32
    return %arg1, %arg2, %c0_i32, %arg0 : i32, i32, i32, i32
  }
}

</mosaic_0001>

<bundles_post_ra>
// kernel: conv_layer_pallas.1
= control target key start
LH: loop header
LB: loop body
LE: loop exit
PB: predicated region body
PF: predicated region fallthrough
CT: control target
= control target key end

     0   :  { %s721_s12 = smov 0   ;;  %s723_s13 = smov 0   ;;  %s918_s0 = inlined_call_operand.vmem [shape: f32[2,1,16,16,128], index: 0, kind: input, shape index: {}]   ;;  %s919_s1 = inlined_call_operand.vmem [shape: f32[1,128,128], index: 1, kind: input, shape index: {}]   ;;  %s920_s2 = inlined_call_operand.vmem [shape: f32[1,128], index: 2, kind: input, shape index: {}]   ;;  %s921_s3 = inlined_call_operand.vmem [shape: f32[2,16,16,128], index: 3, kind: output, shape index: {}]  }
   0x1   :  { %s725_s14 = smov 0  }
   0x2 LB: > { %s28_s15 = sadd.s32 1, %s695_s13  ;;  %p595_p0 = scmp.ge.s32.totalorder %s699_s14, 1  ;;  %s699_s14 = sphi %s725_s14, %s13_s14   ;;  %s695_s13 = sphi %s723_s13, %s923_s13   ;;  %s691_s12 = sphi %s721_s12, %s922_s12  }
   0x3   : > { %p30_p1 = scmp.ge.s32.totalorder %s28_s15, 2  ;;  %p183_p2 = scmp.lt.s32.totalorder %s699_s14, 3 }
   0x5   : > { %s925_s15 = smov (%p30_p1, %s28_s15), 0  ;;  %p184_p3 = pnand %p595_p0, %p183_p2 }
   0x6   : > { %p226_p4 = scmp.lt.s32.totalorder (!%p184_p3), %s691_s12, 1 }
   0x7   : > { %187 = sbr.rel (%p184_p3) target bundleno = 236 (0xec), region = 32 }
   0xc   : > { %v303_v0 = vld [vmem:[%s919_s1 + $0x78] sm:$0xff]  ;;  %v302_v1 = vld [vmem:[%s919_s1 + $0x70] sm:$0xff]  ;;  %v301_v2 = vld [vmem:[%s919_s1 + $0x68] sm:$0xff]  ;;  %s927_s12 = smov (!%p226_p4, %s691_s12), 1 }
   0xd   : > { %605 = vmatpush.msra.mxu2 %v303_v0  ;;  %606 = vmatpush.msra.mxu3 %v303_v0  ;;  %v300_v3 = vld [vmem:[%s919_s1 + $0x60] sm:$0xff]  ;;  %v299_v4 = vld [vmem:[%s919_s1 + $0x58] sm:$0xff]  ;;  %v298_v5 = vld [vmem:[%s919_s1 + $0x50] sm:$0xff]  ;;  %s602_s19 = sshll.u32 %s927_s12, 8 }
   0xe   : > { %308 = vmatpush.msra.mxu0 %v303_v0  ;;  %604 = vmatpush.msra.mxu1 %v303_v0  ;;  %v297_v6 = vld [vmem:[%s919_s1 + $0x48] sm:$0xff]  ;;  %v296_v7 = vld [vmem:[%s919_s1 + $0x40] sm:$0xff]  ;;  %v295_v8 = vld [vmem:[%s919_s1 + $0x38] sm:$0xff]  ;;  %s796_s26 = scalar_lea.vmem %s918_s0, %s602_s19  ;;  %s843_s6 = scalar_lea.vmem %s921_s3, %s602_s19 }
   0xf   : > { %608 = vmatpush.msra.mxu2 %v302_v1  ;;  %609 = vmatpush.msra.mxu3 %v302_v1  ;;  %v294_v9 = vld [vmem:[%s919_s1 + $0x30] sm:$0xff]  ;;  %v293_v10 = vld [vmem:[%s919_s1 + $0x28] sm:$0xff]  ;;  %v292_v11 = vld [vmem:[%s919_s1 + $0x20] sm:$0xff] }
  0x10   : > { %309 = vmatpush.msra.mxu0 %v302_v1  ;;  %607 = vmatpush.msra.mxu1 %v302_v1  ;;  %v291_v12 = vld [vmem:[%s919_s1 + $0x18] sm:$0xff]  ;;  %v290_v13 = vld [vmem:[%s919_s1 + $0x10] sm:$0xff]  ;;  %v289_v14 = vld [vmem:[%s919_s1 + $0x8] sm:$0xff] }
  0x11   : > { %611 = vmatpush.msra.mxu2 %v301_v2  ;;  %612 = vmatpush.msra.mxu3 %v301_v2  ;;  %v288_v15 = vld [vmem:[%s919_s1] sm:$0xff]  ;;  %v273_v20 = vld [vmem:[%s796_s26 + $0x88] sm:$0xff]  ;;  %v274_v24 = vld [vmem:[%s796_s26 + $0x90] sm:$0xff] }
  0x12   : > { %310 = vmatpush.msra.mxu0 %v301_v2  ;;  %610 = vmatpush.msra.mxu1 %v301_v2  ;;  %v272_v16 = vld [vmem:[%s796_s26 + $0x80] sm:$0xff]  ;;  %v281_v21 = vld [vmem:[%s796_s26 + $0xc8] sm:$0xff]  ;;  %v282_v25 = vld [vmem:[%s796_s26 + $0xd0] sm:$0xff] }
  0x13   : > { %614 = vmatpush.msra.mxu2 %v300_v3  ;;  %615 = vmatpush.msra.mxu3 %v300_v3  ;;  %v280_v17 = vld [vmem:[%s796_s26 + $0xc0] sm:$0xff]  ;;  %v257_v22 = vld [vmem:[%s796_s26 + $0x8] sm:$0xff]  ;;  %v258_v26 = vld [vmem:[%s796_s26 + $0x10] sm:$0xff] }
  0x14   : > { %311 = vmatpush.msra.mxu0 %v300_v3  ;;  %613 = vmatpush.msra.mxu1 %v300_v3  ;;  %v256_v18 = vld [vmem:[%s796_s26] sm:$0xff]  ;;  %v265_v23 = vld [vmem:[%s796_s26 + $0x48] sm:$0xff]  ;;  %v266_v27 = vld [vmem:[%s796_s26 + $0x50] sm:$0xff] }
  0x15   : > { %617 = vmatpush.msra.mxu2 %v299_v4  ;;  %618 = vmatpush.msra.mxu3 %v299_v4  ;;  %v264_v19 = vld [vmem:[%s796_s26 + $0x40] sm:$0xff]  ;;  %v275_v28 = vld [vmem:[%s796_s26 + $0x98] sm:$0xff]  ;;  %v277_v36 = vld [vmem:[%s796_s26 + $0xa8] sm:$0xff] }
  0x16   : > { %312 = vmatpush.msra.mxu0 %v299_v4  ;;  %616 = vmatpush.msra.mxu1 %v299_v4  ;;  %v283_v29 = vld [vmem:[%s796_s26 + $0xd8] sm:$0xff]  ;;  %v276_v32 = vld [vmem:[%s796_s26 + $0xa0] sm:$0xff]  ;;  %v285_v37 = vld [vmem:[%s796_s26 + $0xe8] sm:$0xff] }
  0x17   : > { %620 = vmatpush.msra.mxu2 %v298_v5  ;;  %621 = vmatpush.msra.mxu3 %v298_v5  ;;  %v259_v30 = vld [vmem:[%s796_s26 + $0x18] sm:$0xff]  ;;  %v284_v33 = vld [vmem:[%s796_s26 + $0xe0] sm:$0xff]  ;;  %v261_v38 = vld [vmem:[%s796_s26 + $0x28] sm:$0xff] }
  0x18   : > { %313 = vmatpush.msra.mxu0 %v298_v5  ;;  %619 = vmatpush.msra.mxu1 %v298_v5  ;;  %v267_v31 = vld [vmem:[%s796_s26 + $0x58] sm:$0xff]  ;;  %v260_v34 = vld [vmem:[%s796_s26 + $0x20] sm:$0xff]  ;;  %v269_v39 = vld [vmem:[%s796_s26 + $0x68] sm:$0xff] }
  0x19   : > { %623 = vmatpush.msra.mxu2 %v297_v6  ;;  %624 = vmatpush.msra.mxu3 %v297_v6  ;;  %v268_v35 = vld [vmem:[%s796_s26 + $0x60] sm:$0xff]  ;;  %v278_v40 = vld [vmem:[%s796_s26 + $0xb0] sm:$0xff]  ;;  %v279_v44 = vld [vmem:[%s796_s26 + $0xb8] sm:$0xff] }
  0x1a   : > { %314 = vmatpush.msra.mxu0 %v297_v6  ;;  %622 = vmatpush.msra.mxu1 %v297_v6  ;;  %v286_v41 = vld [vmem:[%s796_s26 + $0xf0] sm:$0xff]  ;;  %v287_v45 = vld [vmem:[%s796_s26 + $0xf8] sm:$0xff]  ;;  %v836_v48 = vld [vmem:[%s920_s2] ss:$0 sm:$0xff] }
  0x1b   : > { %626 = vmatpush.msra.mxu2 %v296_v7  ;;  %627 = vmatpush.msra.mxu3 %v296_v7  ;;  %v262_v42 = vld [vmem:[%s796_s26 + $0x30] sm:$0xff]  ;;  %v263_v46 = vld [vmem:[%s796_s26 + $0x38] sm:$0xff] }
  0x1c   : > { %315 = vmatpush.msra.mxu0 %v296_v7  ;;  %625 = vmatpush.msra.mxu1 %v296_v7  ;;  %v270_v43 = vld [vmem:[%s796_s26 + $0x70] sm:$0xff]  ;;  %v271_v47 = vld [vmem:[%s796_s26 + $0x78] sm:$0xff] }
  0x1d   : > { %629 = vmatpush.msra.mxu2 %v295_v8  ;;  %630 = vmatpush.msra.mxu3 %v295_v8 }
  0x1e   : > { %316 = vmatpush.msra.mxu0 %v295_v8  ;;  %628 = vmatpush.msra.mxu1 %v295_v8 }
  0x1f   : > { %632 = vmatpush.msra.mxu2 %v294_v9  ;;  %633 = vmatpush.msra.mxu3 %v294_v9 }
  0x20   : > { %317 = vmatpush.msra.mxu0 %v294_v9  ;;  %631 = vmatpush.msra.mxu1 %v294_v9 }
  0x21   : > { %635 = vmatpush.msra.mxu2 %v293_v10  ;;  %636 = vmatpush.msra.mxu3 %v293_v10 }
  0x22   : > { %318 = vmatpush.msra.mxu0 %v293_v10  ;;  %634 = vmatpush.msra.mxu1 %v293_v10 }
  0x23   : > { %638 = vmatpush.msra.mxu2 %v292_v11  ;;  %639 = vmatpush.msra.mxu3 %v292_v11 }
  0x24   : > { %319 = vmatpush.msra.mxu0 %v292_v11  ;;  %637 = vmatpush.msra.mxu1 %v292_v11 }
  0x25   : > { %641 = vmatpush.msra.mxu2 %v291_v12  ;;  %642 = vmatpush.msra.mxu3 %v291_v12 }
  0x26   : > { %320 = vmatpush.msra.mxu0 %v291_v12  ;;  %640 = vmatpush.msra.mxu1 %v291_v12 }
  0x27   : > { %644 = vmatpush.msra.mxu2 %v290_v13  ;;  %645 = vmatpush.msra.mxu3 %v290_v13 }
  0x28   : > { %321 = vmatpush.msra.mxu0 %v290_v13  ;;  %643 = vmatpush.msra.mxu1 %v290_v13 }
  0x29   : > { %647 = vmatpush.msra.mxu2 %v289_v14  ;;  %648 = vmatpush.msra.mxu3 %v289_v14 }
  0x2a   : > { %322 = vmatpush.msra.mxu0 %v289_v14  ;;  %646 = vmatpush.msra.mxu1 %v289_v14 }
  0x2b   : > { %650 = vmatpush.msra.mxu2 %v288_v15  ;;  %651 = vmatpush.msra.mxu3 %v288_v15 }
  0x2c   : > { %372 = vmatmul.f32.vlgmr.msra.gmra.mxu2 %v272_v16  ;;  %396 = vmatmul.f32.vlgmr.msra.gmra.mxu3 %v280_v17 }
  0x2d   : > { %323 = vmatpush.msra.mxu0 %v288_v15  ;;  %649 = vmatpush.msra.mxu1 %v288_v15 }
  0x2e   : > { %324 = vmatmul.f32.vlgmr.msra.gmra.mxu0 %v256_v18  ;;  %348 = vmatmul.f32.vlgmr.msra.gmra.mxu1 %v264_v19 }
  0x34   : > { %375 = vmatmul.f32.gmra.mxu2 %v273_v20  ;;  %399 = vmatmul.f32.gmra.mxu3 %v281_v21 }
  0x36   : > { %327 = vmatmul.f32.gmra.mxu0 %v257_v22  ;;  %351 = vmatmul.f32.gmra.mxu1 %v265_v23 }
  0x3c   : > { %378 = vmatmul.f32.gmra.mxu2 %v274_v24  ;;  %402 = vmatmul.f32.gmra.mxu3 %v282_v25 }
  0x3e   : > { %330 = vmatmul.f32.gmra.mxu0 %v258_v26  ;;  %354 = vmatmul.f32.gmra.mxu1 %v266_v27 }
  0x44   : > { %381 = vmatmul.f32.gmra.mxu2 %v275_v28  ;;  %405 = vmatmul.f32.gmra.mxu3 %v283_v29 }
  0x46   : > { %333 = vmatmul.f32.gmra.mxu0 %v259_v30  ;;  %357 = vmatmul.f32.gmra.mxu1 %v267_v31 }
  0x4c   : > { %384 = vmatmul.f32.gmra.mxu2 %v276_v32  ;;  %408 = vmatmul.f32.gmra.mxu3 %v284_v33 }
  0x4e   : > { %336 = vmatmul.f32.gmra.mxu0 %v260_v34  ;;  %360 = vmatmul.f32.gmra.mxu1 %v268_v35 }
  0x54   : > { %387 = vmatmul.f32.gmra.mxu2 %v277_v36  ;;  %411 = vmatmul.f32.gmra.mxu3 %v285_v37 }
  0x56   : > { %339 = vmatmul.f32.gmra.mxu0 %v261_v38  ;;  %363 = vmatmul.f32.gmra.mxu1 %v269_v39 }
  0x5c   : > { %390 = vmatmul.f32.gmra.mxu2 %v278_v40  ;;  %414 = vmatmul.f32.gmra.mxu3 %v286_v41 }
  0x5e   : > { %342 = vmatmul.f32.gmra.mxu0 %v262_v42  ;;  %366 = vmatmul.f32.gmra.mxu1 %v270_v43 }
  0x64   : > { %393 = vmatmul.f32.gmra.mxu2 %v279_v44  ;;  %417 = vmatmul.f32.gmra.mxu3 %v287_v45 }
  0x66   : > { %345 = vmatmul.f32.gmra.mxu0 %v263_v46  ;;  %369 = vmatmul.f32.gmra.mxu1 %v271_v47 }
  0xab   : > { %v325_v49 = vpop.f32.mrf.mxu0  ;;  %v349_v50 = vpop.f32.mrf.mxu1 }
  0xac   : > { %v326_v51 = vadd.f32 %v836_v48, %v325_v49  ;;  %v350_v52 = vadd.f32 %v836_v48, %v349_v50 }
  0xae   : > { %421 = vst [vmem:[%s843_s6] sm:$0xff] %v326_v51 }
  0xaf   : > { %429 = vst [vmem:[%s843_s6 + $0x40] sm:$0xff] %v350_v52  ;;  %v373_v53 = vpop.f32.mrf.mxu2  ;;  %v397_v54 = vpop.f32.mrf.mxu3 }
  0xb0   : > { %v374_v55 = vadd.f32 %v836_v48, %v373_v53  ;;  %v398_v56 = vadd.f32 %v836_v48, %v397_v54 }
  0xb2   : > { %437 = vst [vmem:[%s843_s6 + $0x80] sm:$0xff] %v374_v55 }
  0xb3   : > { %445 = vst [vmem:[%s843_s6 + $0xc0] sm:$0xff] %v398_v56  ;;  %v328_v57 = vpop.f32.mrf.mxu0  ;;  %v352_v58 = vpop.f32.mrf.mxu1 }
  0xb4   : > { %v329_v59 = vadd.f32 %v836_v48, %v328_v57  ;;  %v353_v60 = vadd.f32 %v836_v48, %v352_v58 }
  0xb6   : > { %422 = vst [vmem:[%s843_s6 + $0x8] sm:$0xff] %v329_v59 }
  0xb7   : > { %430 = vst [vmem:[%s843_s6 + $0x48] sm:$0xff] %v353_v60  ;;  %v376_v61 = vpop.f32.mrf.mxu2  ;;  %v400_v62 = vpop.f32.mrf.mxu3 }
  0xb8   : > { %v377_v63 = vadd.f32 %v836_v48, %v376_v61  ;;  %v401_v0 = vadd.f32 %v836_v48, %v400_v62 }
  0xba   : > { %438 = vst [vmem:[%s843_s6 + $0x88] sm:$0xff] %v377_v63 }
  0xbb   : > { %446 = vst [vmem:[%s843_s6 + $0xc8] sm:$0xff] %v401_v0  ;;  %v331_v1 = vpop.f32.mrf.mxu0  ;;  %v355_v2 = vpop.f32.mrf.mxu1 }
  0xbc   : > { %v332_v3 = vadd.f32 %v836_v48, %v331_v1  ;;  %v356_v4 = vadd.f32 %v836_v48, %v355_v2 }
  0xbe   : > { %423 = vst [vmem:[%s843_s6 + $0x10] sm:$0xff] %v332_v3 }
  0xbf   : > { %431 = vst [vmem:[%s843_s6 + $0x50] sm:$0xff] %v356_v4  ;;  %v379_v5 = vpop.f32.mrf.mxu2  ;;  %v403_v6 = vpop.f32.mrf.mxu3 }
  0xc0   : > { %v380_v7 = vadd.f32 %v836_v48, %v379_v5  ;;  %v404_v8 = vadd.f32 %v836_v48, %v403_v6 }
  0xc2   : > { %439 = vst [vmem:[%s843_s6 + $0x90] sm:$0xff] %v380_v7 }
  0xc3   : > { %447 = vst [vmem:[%s843_s6 + $0xd0] sm:$0xff] %v404_v8  ;;  %v334_v9 = vpop.f32.mrf.mxu0  ;;  %v358_v10 = vpop.f32.mrf.mxu1 }
  0xc4   : > { %v335_v11 = vadd.f32 %v836_v48, %v334_v9  ;;  %v359_v12 = vadd.f32 %v836_v48, %v358_v10 }
  0xc6   : > { %424 = vst [vmem:[%s843_s6 + $0x18] sm:$0xff] %v335_v11 }
  0xc7   : > { %432 = vst [vmem:[%s843_s6 + $0x58] sm:$0xff] %v359_v12  ;;  %v382_v13 = vpop.f32.mrf.mxu2  ;;  %v406_v14 = vpop.f32.mrf.mxu3 }
  0xc8   : > { %v383_v15 = vadd.f32 %v836_v48, %v382_v13  ;;  %v407_v16 = vadd.f32 %v836_v48, %v406_v14 }
  0xca   : > { %440 = vst [vmem:[%s843_s6 + $0x98] sm:$0xff] %v383_v15 }
  0xcb   : > { %448 = vst [vmem:[%s843_s6 + $0xd8] sm:$0xff] %v407_v16  ;;  %v337_v17 = vpop.f32.mrf.mxu0  ;;  %v361_v18 = vpop.f32.mrf.mxu1 }
  0xcc   : > { %v338_v19 = vadd.f32 %v836_v48, %v337_v17  ;;  %v362_v20 = vadd.f32 %v836_v48, %v361_v18 }
  0xce   : > { %425 = vst [vmem:[%s843_s6 + $0x20] sm:$0xff] %v338_v19 }
  0xcf   : > { %433 = vst [vmem:[%s843_s6 + $0x60] sm:$0xff] %v362_v20  ;;  %v385_v21 = vpop.f32.mrf.mxu2  ;;  %v409_v22 = vpop.f32.mrf.mxu3 }
  0xd0   : > { %v386_v23 = vadd.f32 %v836_v48, %v385_v21  ;;  %v410_v24 = vadd.f32 %v836_v48, %v409_v22 }
  0xd2   : > { %441 = vst [vmem:[%s843_s6 + $0xa0] sm:$0xff] %v386_v23 }
  0xd3   : > { %449 = vst [vmem:[%s843_s6 + $0xe0] sm:$0xff] %v410_v24  ;;  %v340_v25 = vpop.f32.mrf.mxu0  ;;  %v364_v26 = vpop.f32.mrf.mxu1 }
  0xd4   : > { %v341_v27 = vadd.f32 %v836_v48, %v340_v25  ;;  %v365_v28 = vadd.f32 %v836_v48, %v364_v26 }
  0xd6   : > { %426 = vst [vmem:[%s843_s6 + $0x28] sm:$0xff] %v341_v27 }
  0xd7   : > { %434 = vst [vmem:[%s843_s6 + $0x68] sm:$0xff] %v365_v28  ;;  %v388_v29 = vpop.f32.mrf.mxu2  ;;  %v412_v30 = vpop.f32.mrf.mxu3 }
  0xd8   : > { %v389_v31 = vadd.f32 %v836_v48, %v388_v29  ;;  %v413_v32 = vadd.f32 %v836_v48, %v412_v30 }
  0xda   : > { %442 = vst [vmem:[%s843_s6 + $0xa8] sm:$0xff] %v389_v31 }
  0xdb   : > { %450 = vst [vmem:[%s843_s6 + $0xe8] sm:$0xff] %v413_v32  ;;  %v343_v33 = vpop.f32.mrf.mxu0  ;;  %v367_v34 = vpop.f32.mrf.mxu1 }
  0xdc   : > { %v344_v35 = vadd.f32 %v836_v48, %v343_v33  ;;  %v368_v36 = vadd.f32 %v836_v48, %v367_v34 }
  0xde   : > { %427 = vst [vmem:[%s843_s6 + $0x30] sm:$0xff] %v344_v35 }
  0xdf   : > { %435 = vst [vmem:[%s843_s6 + $0x70] sm:$0xff] %v368_v36  ;;  %v391_v37 = vpop.f32.mrf.mxu2  ;;  %v415_v38 = vpop.f32.mrf.mxu3 }
  0xe0   : > { %v392_v39 = vadd.f32 %v836_v48, %v391_v37  ;;  %v416_v40 = vadd.f32 %v836_v48, %v415_v38 }
  0xe2   : > { %443 = vst [vmem:[%s843_s6 + $0xb0] sm:$0xff] %v392_v39 }
  0xe3   : > { %451 = vst [vmem:[%s843_s6 + $0xf0] sm:$0xff] %v416_v40  ;;  %v346_v41 = vpop.f32.mrf.mxu0  ;;  %v370_v42 = vpop.f32.mrf.mxu1 }
  0xe4   : > { %v347_v43 = vadd.f32 %v836_v48, %v346_v41  ;;  %v371_v44 = vadd.f32 %v836_v48, %v370_v42 }
  0xe6   : > { %428 = vst [vmem:[%s843_s6 + $0x38] sm:$0xff] %v347_v43 }
  0xe7   : > { %436 = vst [vmem:[%s843_s6 + $0x78] sm:$0xff] %v371_v44  ;;  %v394_v45 = vpop.f32.mrf.mxu2  ;;  %v418_v46 = vpop.f32.mrf.mxu3 }
  0xe8   : > { %v395_v47 = vadd.f32 %v836_v48, %v394_v45  ;;  %v419_v49 = vadd.f32 %v836_v48, %v418_v46 }
  0xea   : > { %444 = vst [vmem:[%s843_s6 + $0xb8] sm:$0xff] %v395_v47 }
  0xeb   : > { %452 = vst [vmem:[%s843_s6 + $0xf8] sm:$0xff] %v419_v49 }
  0xec PF: > { %s13_s14 = sadd.s32 1, %s699_s14   ;;  %s922_s12 = smov %s695_s13 }
  0xed   : > { %p10_p5 = scmp.ge.s32.totalorder %s13_s14, 4   ;;  %s923_s13 = smov %s925_s15 }
  0xef   :  { %12 = sbr.rel (!%p10_p5) target bundleno = 2 (0x2), region = 68 }

</bundles_post_ra>
